<compile_context>
chip_gen: v7x
topology: tpu7x:2x2x1
jax: 0.10.0
libtpu: 0.0.40
codegen_flags: <defaults>
</compile_context>

<pallas_src>
import functools

import jax
import jax.numpy as jnp
from jax.experimental import pallas as pl
from jax.experimental.pallas import tpu as pltpu


def _round_up(x, m):
    return ((x + m - 1) // m) * m


def _vmem_limit_bytes():
    """Generation-aware scoped-VMEM budget: ~75% of physical VMEM, clamped to
    [32 MiB, 96 MiB] (=> ~48 MiB on v7x's 64 MiB, 96 MiB on v5e/v6e's 128 MiB)."""
    try:
        cap = int(pltpu.get_tpu_info().vmem_capacity_bytes)
    except Exception:
        cap = 64 * 1024 * 1024  # conservative fallback, safe on every generation
    return max(32 * 1024 * 1024, min(cap * 3 // 4, 96 * 1024 * 1024))


def _deepfm_kernel(x_ref, w0_ref, w1_ref, pk_ref, out_ref, *, fe, h0_dim, h1_dim):
    """x_ref: (tb, FE+1) packed [flattened feature_value_embed | fm_scalar],
    where fm_scalar = first_res @ wf1 + second_res @ wf2 + final_bias was
    precomputed in the gather-fused wrapper.
    pk_ref: (3, Hmax) packed small residents: row0=b0, row1=b1, row2=wfd."""
    x = x_ref[...]
    fve = x[:, :fe]                       # (tb, FE)  deep-part input
    fm = x[:, fe:fe + 1]                  # (tb, 1)   FM + final-bias contribution

    b0 = pk_ref[0:1, :h0_dim]             # (1, H0)
    b1 = pk_ref[1:2, :h1_dim]             # (1, H1)
    wfd = pk_ref[2:3, :h1_dim]            # (1, H1)   final weight rows for the deep part

    # Deep part: Linear (BN scale/shift + bias pre-folded into W/b) + ReLU, twice.
    h0 = jnp.dot(fve, w0_ref[...], preferred_element_type=jnp.float32) + b0
    h0 = jnp.maximum(h0, 0.0)
    h1 = jnp.dot(h0, w1_ref[...], preferred_element_type=jnp.float32) + b1
    h1 = jnp.maximum(h1, 0.0)

    # Width-1 output: VPU multiply + lane reduce (no N=1 MXU matmul).
    out_ref[...] = fm + jnp.sum(h1 * wfd, axis=-1, keepdims=True)


def init_params(key, n_feature, n_field, embedding_dim, ffn_size):
    """Deterministic synthetic parameter init (Xavier-normal for embeddings,
    small-normal for Linear layers, default BatchNorm stats)."""
    assert len(ffn_size) == 2, "this script hardcodes two FFN layers"
    keys = jax.random.split(key, 10)

    def xavier(k, shape):
        fan_in, fan_out = shape[0], shape[1]
        std = (2.0 / (fan_in + fan_out)) ** 0.5
        return std * jax.random.normal(k, shape, dtype=jnp.float32)

    nn_dim = [n_field * embedding_dim] + list(ffn_size)
    params = {
        "fd_w": xavier(keys[0], (n_feature, 1)),                 # first_degree_weight
        "emb_w": xavier(keys[1], (n_feature, embedding_dim)),    # feature_embedding_weight
        "ffn_w": [xavier(keys[2], (nn_dim[0], nn_dim[1])),
                  xavier(keys[3], (nn_dim[1], nn_dim[2]))],
        "ffn_b": [0.01 * jax.random.normal(keys[4], (nn_dim[1],), dtype=jnp.float32),
                  0.01 * jax.random.normal(keys[5], (nn_dim[2],), dtype=jnp.float32)],
        # BatchNorm1d params: (gamma, beta, running_mean, running_var)
        "bn": [(jnp.ones((nn_dim[1],), jnp.float32), jnp.zeros((nn_dim[1],), jnp.float32),
                jnp.zeros((nn_dim[1],), jnp.float32), jnp.ones((nn_dim[1],), jnp.float32)),
               (jnp.ones((nn_dim[2],), jnp.float32), jnp.zeros((nn_dim[2],), jnp.float32),
                jnp.zeros((nn_dim[2],), jnp.float32), jnp.ones((nn_dim[2],), jnp.float32))],
        "final_w": xavier(keys[6], (n_field + embedding_dim + ffn_size[-1], 1)),
        "final_b": 0.01 * jax.random.normal(keys[7], (1,), dtype=jnp.float32),
    }
    return params


@functools.partial(jax.jit, static_argnames=("tile_b",))
def deepfm_forward(params, feature_index, feature_value, *, tile_b=4096):
    B, F = feature_index.shape
    E = params["emb_w"].shape[1]
    H0 = params["ffn_w"][0].shape[1]
    H1 = params["ffn_w"][1].shape[1]
    FE = F * E

    # --- choose the batch tile; keep >= 2 grid steps when possible (v7x megacore) ---
    tb = min(tile_b, _round_up(B, 8))
    if B > 8 and pl.cdiv(B, tb) < 2:
        tb = _round_up(pl.cdiv(B, 2), 8)
    num_tiles = pl.cdiv(B, tb)
    B_pad = num_tiles * tb

    # Pad only the small (B, F) gather inputs, not the big packed slab, so the
    # padded slab is produced directly by the gather-fused ops (no extra HBM pass).
    fi = feature_index
    fv = feature_value.astype(jnp.float32)
    if B_pad != B:
        fi = jnp.pad(fi, ((0, B_pad - B), (0, 0)))   # index 0 is a valid row
        fv = jnp.pad(fv, ((0, B_pad - B), (0, 0)))

    # --- gathers + gather-fused FM work (hoisted out of the kernel) ---
    fdw = params["fd_w"][fi, 0]                      # (Bp, F)
    emb = params["emb_w"][fi]                        # (Bp, F, E)
    fve3 = emb * fv[:, :, None]                      # (Bp, F, E) feature_value_embed
    fve = fve3.reshape(B_pad, FE)                    # (Bp, FE)   deep-part input
    first_res = fv * fdw                             # (Bp, F)
    sum_e = jnp.sum(fve3, axis=1)                    # (Bp, E)
    sq_sum = jnp.sum(fve3 * fve3, axis=1)            # (Bp, E)
    second_res = 0.5 * (sum_e * sum_e - sq_sum)      # (Bp, E)

    wf = params["final_w"]                           # (F + E + H1, 1)
    bf = params["final_b"]                           # (1,)
    # FM (first + second degree) contribution to the final width-1 linear + bias.
    fm_scalar = first_res @ wf[:F] + second_res @ wf[F:F + E] + bf      # (Bp, 1)

    # Single lane-dense activation slab streamed by the kernel.
    x = jnp.concatenate([fve, fm_scalar], axis=1)    # (Bp, FE + 1)

    # --- fold eval-mode BatchNorm (+ Linear bias) into the Linear weights (exact) ---
    eps = 1e-5
    w0, w1 = params["ffn_w"]
    b0, b1 = params["ffn_b"]
    (g0, be0, m0, v0), (g1, be1, m1, v1) = params["bn"]
    s0 = g0 / jnp.sqrt(v0 + eps)
    s1 = g1 / jnp.sqrt(v1 + eps)
    w0p = w0 * s0[None, :]
    b0p = b0 * s0 + (be0 - m0 * s0)                  # (H0,)
    w1p = w1 * s1[None, :]
    b1p = b1 * s1 + (be1 - m1 * s1)                  # (H1,)

    # --- pack the tiny residents [b0 | b1 | wfd] into one (3, Hmax) slab ---
    Hmax = max(H0, H1)

    def row(v):
        return jnp.pad(v, (0, Hmax - v.shape[0])).reshape(1, Hmax)

    pk = jnp.concatenate([row(b0p), row(b1p), row(wf[F + E:, 0])], axis=0)   # (3, Hmax)

    kernel = functools.partial(_deepfm_kernel, fe=FE, h0_dim=H0, h1_dim=H1)

    def resident(shape):
        return pl.BlockSpec(shape, lambda i: (0, 0))  # constant index -> stays in VMEM

    out = pl.pallas_call(
        kernel,
        out_shape=jax.ShapeDtypeStruct((B_pad, 1), jnp.float32),
        grid=(num_tiles,),
        in_specs=[pl.BlockSpec((tb, FE + 1), lambda i: (i, 0)),
                  resident(w0p.shape),
                  resident(w1p.shape),
                  resident(pk.shape)],
        out_specs=pl.BlockSpec((tb, 1), lambda i: (i, 0)),
        compiler_params=pltpu.CompilerParams(
            dimension_semantics=("parallel",),
            vmem_limit_bytes=_vmem_limit_bytes()),
    )(x, w0p, w1p, pk)
    return out[:B]


def deepfm_reference(params, feature_index, feature_value):
    """Pure-JAX reference mirroring the PyTorch forward (eval mode)."""
    fv = feature_value[:, :, None]
    fdw = params["fd_w"][feature_index]             # (B, F, 1)
    emb = params["emb_w"][feature_index]            # (B, F, E)
    fve = emb * fv
    first_res = jnp.squeeze(fv * fdw, 2)
    int_sum_square = jnp.sum(fve, 1) ** 2
    int_square_sum = jnp.sum(fve ** 2, 1)
    second_res = 0.5 * (int_sum_square - int_square_sum)
    x = fve.reshape(fve.shape[0], -1)
    eps = 1e-5
    for i in range(2):
        x = x @ params["ffn_w"][i] + params["ffn_b"][i]
        g, b, m, v = params["bn"][i]
        x = (x - m) / jnp.sqrt(v + eps) * g + b
        x = jnp.maximum(x, 0.0)
    inp = jnp.concatenate([first_res, second_res, x], axis=1)
    return inp @ params["final_w"] + params["final_b"]


if __name__ == "__main__":
    # Small shapes consistent with the module's forward.
    n_feature, n_field, embedding_dim = 64, 4, 8
    ffn_size = [32, 16]
    batch = 29          # not a multiple of the tile -> exercises padding + multi-tile grid

    key = jax.random.PRNGKey(0)
    k_param, k_idx, k_val = jax.random.split(key, 3)
    params = init_params(k_param, n_feature, n_field, embedding_dim, ffn_size)

    feature_index = jax.random.randint(k_idx, (batch, n_field), 0, n_feature, dtype=jnp.int32)
    feature_value = jax.random.uniform(k_val, (batch, n_field), dtype=jnp.float32)

    ref = deepfm_reference(params, feature_index, feature_value)

    # Small explicit tile (4 grid steps) and the large default tile (>=2-step path).
    out_small = jax.block_until_ready(
        deepfm_forward(params, feature_index, feature_value, tile_b=8))
    out_big = jax.block_until_ready(
        deepfm_forward(params, feature_index, feature_value))

    assert out_small.shape == (batch, 1) and out_big.shape == (batch, 1)
    assert jnp.allclose(out_small, ref, atol=1e-4, rtol=1e-4), (out_small, ref)
    assert jnp.allclose(out_big, ref, atol=1e-4, rtol=1e-4), (out_big, ref)

    print("KERNEL_OK")
</pallas_src>

<mosaic_0001>
module attributes {stable_mosaic.version = 11 : i64} {
  func.func @_deepfm_kernel(%arg0: i32, %arg1: memref<8x33xf32, #tpu.memory_space<vmem>>, %arg2: memref<32x32xf32, #tpu.memory_space<vmem>>, %arg3: memref<32x16xf32, #tpu.memory_space<vmem>>, %arg4: memref<3x32xf32, #tpu.memory_space<vmem>>, %arg5: memref<8x1xf32, #tpu.memory_space<vmem>>) attributes {dimension_semantics = [#tpu.dimension_semantics<parallel>], iteration_bounds = array<i64: 4>, scalar_prefetch = 0 : i64, scratch_operands = 0 : i64, tpu.core_type = #tpu.core_type<tc>, window_params = [{transform_indices = @transform_0, window_bounds = array<i64: 8, 33>}, {pipeline_mode = #tpu.pipeline_mode<synchronous>, transform_indices = @transform_1, window_bounds = array<i64: 32, 32>}, {pipeline_mode = #tpu.pipeline_mode<synchronous>, transform_indices = @transform_2, window_bounds = array<i64: 32, 16>}, {pipeline_mode = #tpu.pipeline_mode<synchronous>, transform_indices = @transform_3, window_bounds = array<i64: 3, 32>}, {transform_indices = @transform_4, window_bounds = array<i64: 8, 1>}]} {
    %c0 = arith.constant 0 : index
    %c0_0 = arith.constant 0 : index
    %0 = vector.load %arg1[%c0, %c0_0] : memref<8x33xf32, #tpu.memory_space<vmem>>, vector<8x33xf32>
    %1 = vector.extract_strided_slice %0 {offsets = [0, 0], sizes = [8, 32], strides = [1, 1]} : vector<8x33xf32> to vector<8x32xf32>
    %2 = vector.extract_strided_slice %0 {offsets = [0, 32], sizes = [8, 1], strides = [1, 1]} : vector<8x33xf32> to vector<8x1xf32>
    %c0_1 = arith.constant 0 : index
    %c0_2 = arith.constant 0 : index
    %3 = vector.load %arg4[%c0_1, %c0_2] : memref<3x32xf32, #tpu.memory_space<vmem>>, vector<1x32xf32>
    %c1 = arith.constant 1 : index
    %c0_3 = arith.constant 0 : index
    %4 = vector.load %arg4[%c1, %c0_3] : memref<3x32xf32, #tpu.memory_space<vmem>>, vector<1x16xf32>
    %c2 = arith.constant 2 : index
    %c0_4 = arith.constant 0 : index
    %5 = vector.load %arg4[%c2, %c0_4] : memref<3x32xf32, #tpu.memory_space<vmem>>, vector<1x16xf32>
    %c0_5 = arith.constant 0 : index
    %c0_6 = arith.constant 0 : index
    %6 = vector.load %arg2[%c0_5, %c0_6] : memref<32x32xf32, #tpu.memory_space<vmem>>, vector<32x32xf32>
    %cst = arith.constant dense<0.000000e+00> : vector<8x32xf32>
    %7 = tpu.matmul %1, %6, %cst {dimension_numbers = #tpu.dot_dimension_numbers<[1], [0], [0], [1], [0, 0, 1, 1], [], []>} : vector<8x32xf32>, vector<32x32xf32>, vector<8x32xf32> -> vector<8x32xf32>
    %8 = vector.broadcast %3 : vector<1x32xf32> to vector<8x32xf32>
    %9 = arith.addf %7, %8 : vector<8x32xf32>
    %cst_7 = arith.constant 0.000000e+00 : f32
    %10 = vector.broadcast %cst_7 : f32 to vector<8x32xf32>
    %11 = arith.maximumf %9, %10 : vector<8x32xf32>
    %c0_8 = arith.constant 0 : index
    %c0_9 = arith.constant 0 : index
    %12 = vector.load %arg3[%c0_8, %c0_9] : memref<32x16xf32, #tpu.memory_space<vmem>>, vector<32x16xf32>
    %cst_10 = arith.constant dense<0.000000e+00> : vector<8x16xf32>
    %13 = tpu.matmul %11, %12, %cst_10 {dimension_numbers = #tpu.dot_dimension_numbers<[1], [0], [0], [1], [0, 0, 1, 1], [], []>} : vector<8x32xf32>, vector<32x16xf32>, vector<8x16xf32> -> vector<8x16xf32>
    %14 = vector.broadcast %4 : vector<1x16xf32> to vector<8x16xf32>
    %15 = arith.addf %13, %14 : vector<8x16xf32>
    %cst_11 = arith.constant 0.000000e+00 : f32
    %16 = vector.broadcast %cst_11 : f32 to vector<8x16xf32>
    %17 = arith.maximumf %15, %16 : vector<8x16xf32>
    %18 = vector.broadcast %5 : vector<1x16xf32> to vector<8x16xf32>
    %19 = arith.mulf %17, %18 : vector<8x16xf32>
    %cst_12 = arith.constant dense<0.000000e+00> : vector<8xf32>
    %20 = vector.multi_reduction <add>, %19, %cst_12 [1] : vector<8x16xf32> to vector<8xf32>
    %21 = vector.shape_cast %20 : vector<8xf32> to vector<8x1xf32>
    %22 = arith.addf %2, %21 : vector<8x1xf32>
    %c0_13 = arith.constant 0 : index
    %c0_14 = arith.constant 0 : index
    %23 = vector.load %arg5[%c0_13, %c0_14] : memref<8x1xf32, #tpu.memory_space<vmem>>, vector<8x1xf32>
    tpu.vector_store %arg5[%c0_13, %c0_14], %22 {strides = array<i32>} : memref<8x1xf32, #tpu.memory_space<vmem>>, vector<8x1xf32>,
    return
  }
  func.func @transform_0(%arg0: i32) -> (i32, i32) {
    %c0_i32 = arith.constant 0 : i32
    %c0_i32_0 = arith.constant 0 : i32
    return %arg0, %c0_i32 : i32, i32
  }
  func.func @transform_1(%arg0: i32) -> (i32, i32) {
    %c0_i32 = arith.constant 0 : i32
    %c0_i32_0 = arith.constant 0 : i32
    %c0_i32_1 = arith.constant 0 : i32
    return %c0_i32, %c0_i32_0 : i32, i32
  }
  func.func @transform_2(%arg0: i32) -> (i32, i32) {
    %c0_i32 = arith.constant 0 : i32
    %c0_i32_0 = arith.constant 0 : i32
    %c0_i32_1 = arith.constant 0 : i32
    return %c0_i32, %c0_i32_0 : i32, i32
  }
  func.func @transform_3(%arg0: i32) -> (i32, i32) {
    %c0_i32 = arith.constant 0 : i32
    %c0_i32_0 = arith.constant 0 : i32
    %c0_i32_1 = arith.constant 0 : i32
    return %c0_i32, %c0_i32_0 : i32, i32
  }
  func.func @transform_4(%arg0: i32) -> (i32, i32) {
    %c0_i32 = arith.constant 0 : i32
    %c0_i32_0 = arith.constant 0 : i32
    return %arg0, %c0_i32 : i32, i32
  }
}

</mosaic_0001>

<bundles_post_ra>
// kernel: deepfm_forward.1
= control target key start
LH: loop header
LB: loop body
LE: loop exit
PB: predicated region body
PF: predicated region fallthrough
CT: control target
= control target key end

     0   :  { %s538_s15 = smov 0   ;;  %s595_s0 = inlined_call_operand.vmem [shape: f32[32,33], index: 0, kind: input, shape index: {}]   ;;  %s596_s1 = inlined_call_operand.vmem [shape: f32[32,32], index: 1, kind: input, shape index: {}]   ;;  %s597_s2 = inlined_call_operand.vmem [shape: f32[32,16], index: 2, kind: input, shape index: {}]   ;;  %s598_s3 = inlined_call_operand.vmem [shape: f32[3,32], index: 3, kind: input, shape index: {}]   ;;  %s599_s4 = inlined_call_operand.vmem [shape: f32[32,1], index: 4, kind: output, shape index: {}]  }
   0x1 LB: > { %s431_s16 = sadd.s32 4294967295, %s507_s15   ;;  %p435_p0 = scmp.ge.s32.totalorder %s507_s15, 1  ;;  %s507_s15 = sphi %s538_s15, %s14_s15  }
   0x2   : > { %p161_p1 = scmp.lt.s32.totalorder %s507_s15, 5 }
   0x4   : > { %p162_p2 = pnand %p435_p0, %p161_p1 }
   0x5   : > { %v197_v0 = vld [vmem:[%s596_s1] sm:$0xff] (!%p162_p2)  ;;  %v198_v1 = vld [vmem:[%s596_s1 + $0x8] sm:$0xff] (!%p162_p2)  ;;  %v199_v2 = vld [vmem:[%s596_s1 + $0x10] sm:$0xff] (!%p162_p2)  ;;  %v509_v3 = vmov (!%p162_p2), 0.0|0.0   ;;  %vm510_vm0 = vmmov (!%p162_p2), 0   ;;  %v511_v6 = vmov (!%p162_p2), 0.0  }
   0x6   : > { %165 = sbr.rel (%p162_p2) target bundleno = 712 (0x2c8), region = 36  ;;  %477 = vmatprep.subr.bf16.mxu0 (!%p162_p2), %v509_v3  ;;  %v478_v4 = vpack.c.bf16 (!%p162_p2), %v198_v1, %v197_v0  ;;  %v200_v5 = vld [vmem:[%s596_s1 + $0x18] sm:$0xff] (!%p162_p2)  ;;  %463 = vmatprep.mubr.msk.f32.mxu0 (!%p162_p2), %vm510_vm0, %v511_v6  ;;  %p185_p3 = scmp.lt.s32.totalorder (!%p162_p2), %s431_s16, 3  ;;  %v280_v7 = vld [vmem:[%s597_s2] sm:$0xff] (!%p162_p2)  ;;  %v281_v8 = vld [vmem:[%s597_s2 + $0x8] sm:$0xff] (!%p162_p2)  ;;  %vm205_vm1 = vcmask (!%p162_p2), 261120  }
   0x7   : > { %483 = vmatprep.subr.bf16.mxu1 (!%p162_p2), %v509_v3  ;;  %v484_v9 = vpack.c.bf16 (!%p162_p2), %v281_v8, %v280_v7  ;;  %474 = vmatprep.mubr.msk.f32.mxu1 (!%p162_p2), %vm510_vm0, %v511_v6  ;;  %v481_v10 = vpack.c.bf16 (!%p162_p2), %v200_v5, %v199_v2  ;;  %v282_v12 = vld [vmem:[%s597_s2 + $0x10] sm:$0xff] (!%p162_p2)  ;;  %v283_v13 = vld [vmem:[%s597_s2 + $0x18] sm:$0xff] (!%p162_p2)  ;;  %v438_v15 = vld [vmem:[%s598_s3] ss:$0 sm:$0xff] (!%p162_p2)  ;;  %vm367_vm2 = vcmask (!%p162_p2), 130048   ;;  %s512_s19 = smov (!%p162_p2), 96  }
   0x8   : > { %479 = vmatpush3.bf16.msra.mxu0 (!%p162_p2), %v478_v4  ;;  %v487_v14 = vpack.c.bf16 (!%p162_p2), %v283_v13, %v282_v12  ;;  %v440_v20 = vld [vmem:[%s598_s3 + $0x1] ss:$0 sm:$0xff] (!%p162_p2)  ;;  %v442_v24 = vld [vmem:[%s598_s3 + $0x2] ss:$0 sm:$0xff] (!%p162_p2)  ;;  %vm376_vm3 = vcmask (!%p162_p2), 7168  }
   0x9   : > { %480 = vmatprep.subr.bf16.mxu0 (!%p162_p2), %v509_v3  ;;  %485 = vmatpush3.bf16.msra.mxu1 (!%p162_p2), %v484_v9 }
   0xa   : > { %486 = vmatprep.subr.bf16.mxu1 (!%p162_p2), %v509_v3 }
   0xc   : > { %482 = vmatpush3.bf16.msra.mxu0 (!%p162_p2), %v481_v10 }
   0xd   : > { %s601_s16 = smov (!%p185_p3, %s431_s16), 3  ;;  %488 = vmatpush3.bf16.msra.mxu1 %v487_v14 }
   0xe   : > { %s436_s29 = sshll.u32 %s601_s16, 3 }
   0xf   : > { %s188_s6 = scalar_lea.vmem %s595_s0, %s436_s29  ;;  %s192_s22 = scalar_lea.vmem %s599_s4, %s436_s29 }
  0x10   : > { %v193_v11 = vld [vmem:[%s188_s6] sm:$0xff] }
  0x11   : > { %464 = vmatmul.mubr.msk.f32.vlgmr.msra.gmra.mrb[0].mxu0 %vm205_vm1, %v193_v11 }
  0xe4   : > { %v275_v16 = vpop.f32.mrb[0].mxu0 }
  0xe5   : > { %v276_v17 = vadd.f32 %v438_v15, %v275_v16  ;;  %v465_v18 = vpop.f32.mrb[1].mxu0 }
  0xe7   : > { %v279_v19 = vmax.f32 %v276_v17, 0.0 }
  0xe9   : > { %475 = vmatmul.mubr.msk.f32.vlgmr.msra.gmra.mrb[0].mxu1 %vm205_vm1, %v279_v19 }
 0x1bc   : > { %v357_v21 = vpop.f32.mrb[0].mxu1 }
 0x1bd   : > { %v358_v22 = vadd.f32 %v440_v20, %v357_v21  ;;  %v476_v23 = vpop.f32.mrb[1].mxu1 }
 0x1bf   : > { %v361_v25 = vmax.f32 %v358_v22, 0.0 }
 0x1c1   : > { %v366_v26 = vmul.f32 %v442_v24, %v361_v25 }
 0x1c3   : > { %v368_v27 = vsel %vm367_vm2, %v366_v26, 0.0 }
 0x1c4   : > { %369 = vadd.xlane.f32.xlu0 %v368_v27 }
 0x251   : > { %v370_v28 = vpop.xlane.xlu0 %369 }
 0x252   : > { %v371_v29 = vadd.f32 %v370_v28, %v193_v11 }
 0x254   : > { %373 = vrot.lane.b32.xlu0 %v371_v29, %s512_s19 }
 0x2c6   : > { %v374_v30 = vpop.permute.xlu0 %373 }
 0x2c7   : > { %377 = vst.msk [vmem:[%s192_s22] sm:$0xff] %vm376_vm3, %v374_v30 }
 0x2c8 PF: > { %s14_s15 = sadd.s32 1, %s507_s15  }
 0x2c9   : > { %p11_p4 = scmp.ge.s32.totalorder %s14_s15, 6  }
 0x2cb   :  { %13 = sbr.rel (!%p11_p4) target bundleno = 1 (0x1), region = 66 }

</bundles_post_ra>
